<compile_context>
chip_gen: v7x
topology: tpu7x:2x2x1
jax: 0.10.0
libtpu: 0.0.40
codegen_flags: <defaults>
</compile_context>

<pallas_src>
import functools

import jax
import jax.numpy as jnp
from jax import lax
from jax.experimental import pallas as pl
from jax.experimental.pallas import tpu as pltpu


# VMEM spent on streamed tiles (double-buffered in+out blocks + f32 temp).
# 40 MiB keeps v7x (64 MiB physical) comfortable and is well under v5e/v6e's
# 128 MiB physical once vmem_limit_bytes is raised above their scoped defaults.
_TILE_VMEM_BUDGET = 40 << 20


def _round_up(x, m):
    return ((x + m - 1) // m) * m


def _pick_row_tile(n_rows, h_pad, dtype, budget_bytes):
    """Largest sublane-aligned row tile whose pipeline working set fits budget."""
    item = jnp.dtype(dtype).itemsize
    # Per row: double-buffered input block + double-buffered output block
    # (2 * 2 * h * itemsize) plus the f32 compute temp the kernel keeps live.
    per_row = 4 * h_pad * item + 4 * h_pad
    rt = int(budget_bytes // per_row)
    rt = max(8, min(rt, 1024))          # cap: diminishing returns past ~1024 rows
    rt = min(rt, _round_up(n_rows, 8))  # no point tiling wider than the problem
    return max(8, (rt // 8) * 8)


def _row_axis_semantics():
    """CORE_PARALLEL on v7x (2 TCs/chip) so both cores drive HBM; else parallel."""
    try:
        kind = jax.devices()[0].device_kind.lower()
    except Exception:  # pragma: no cover - defensive, e.g. no devices at trace time
        kind = ""
    if "v7" in kind or "tpu7" in kind:
        return (pltpu.CORE_PARALLEL,)
    return ("parallel",)


def _rmsnorm_kernel(x_ref, w_ref, o_ref, *, eps, inv_h):
    """One grid step: RMSNorm over the last (hidden) axis of a row tile.

    x_ref: (TR, Hp)  input rows                        VMEM
    w_ref: (1,  Hp)  f32 layernorm weight (pre-cast)   VMEM (same block every step)
    o_ref: (TR, Hp)  normalized output                 VMEM
    """
    x = x_ref[...].astype(jnp.float32)                 # (TR, Hp) f32 compute temp
    ss = jnp.sum(x * x, axis=-1, keepdims=True)        # (TR, 1)  XLU lane-reduce
    inv = lax.rsqrt(ss * inv_h + eps)                  # EUP slot; /h uses TRUE h
    o_ref[...] = (x * inv * w_ref[...]).astype(o_ref.dtype)


def fln_pipe_layer(hidden_states, labels, weight, *, eps=1e-5, row_tile=None,
                   tile_vmem_budget=_TILE_VMEM_BUDGET):
    """Pallas implementation of FLNPipeLayer.forward.

    hidden_states: (s, b, h) float32/bf16  (seq-major, from the embedding stage)
    labels:        (b, s) int32            (passed through untouched)
    weight:        (h,)                    RMSNorm scale
    returns: (final_layernorm(hidden_states) [s, b, h], labels)
    """
    s, b, h = hidden_states.shape
    n_rows = s * b

    # Lane-dense hidden dim: pad h to a multiple of 128 (guardrail — avoids
    # masked vst.msk partial stores). Variance divides by the TRUE h below.
    h_pad = _round_up(h, 128)

    if row_tile is None:
        row_tile = _pick_row_tile(n_rows, h_pad, hidden_states.dtype, tile_vmem_budget)
    row_tile = max(8, (min(row_tile, _round_up(n_rows, 8)) // 8) * 8)

    # Ragged rows: zero-pad (s*b) up to a row_tile multiple instead of asserting.
    rows_pad = _round_up(n_rows, row_tile)

    # Glue (free contiguous reshape): present rows as a lane/sublane-dense 2-D
    # slab so loads/stores are full vregs; reshape/crop back afterwards.
    x2d = hidden_states.reshape(n_rows, h)
    if rows_pad != n_rows or h_pad != h:
        x2d = jnp.pad(x2d, ((0, rows_pad - n_rows), (0, h_pad - h)))
    w2d = weight.astype(jnp.float32).reshape(1, h)
    if h_pad != h:
        w2d = jnp.pad(w2d, ((0, 0), (0, h_pad - h)))

    itemsize = jnp.dtype(hidden_states.dtype).itemsize
    block_bytes = row_tile * h_pad * itemsize
    # Double-buffered in + out blocks, the f32 compute temp, the (tiny) weight.
    vmem_needed = 4 * block_bytes + row_tile * h_pad * 4 + 2 * h_pad * 4
    vmem_limit = int(max(vmem_needed + (6 << 20), 32 << 20))

    grid = (rows_pad // row_tile,)

    out2d = pl.pallas_call(
        functools.partial(_rmsnorm_kernel, eps=float(eps), inv_h=1.0 / float(h)),
        out_shape=jax.ShapeDtypeStruct((rows_pad, h_pad), hidden_states.dtype),
        grid_spec=pltpu.PrefetchScalarGridSpec(
            num_scalar_prefetch=0,
            grid=grid,
            in_specs=[
                pl.BlockSpec((row_tile, h_pad), lambda i: (i, 0)),  # streamed rows
                pl.BlockSpec((1, h_pad), lambda i: (0, 0)),         # weight, reused
            ],
            out_specs=pl.BlockSpec((row_tile, h_pad), lambda i: (i, 0)),
        ),
        compiler_params=pltpu.CompilerParams(
            dimension_semantics=_row_axis_semantics(),
            vmem_limit_bytes=vmem_limit,
        ),
        cost_estimate=pl.CostEstimate(
            flops=4 * rows_pad * h_pad,        # square, reduce-add, inv-scale, weight
            transcendentals=rows_pad,          # one rsqrt per row
            bytes_accessed=2 * rows_pad * h_pad * itemsize + h_pad * 4,
        ),
    )(x2d, w2d)

    if rows_pad != n_rows or h_pad != h:
        out2d = out2d[:n_rows, :h]
    return out2d.reshape(s, b, h), labels


if __name__ == "__main__":
    key = jax.random.PRNGKey(0)

    def reference(x, w, eps=1e-5):
        x32 = x.astype(jnp.float32)
        var = jnp.mean(x32 * x32, axis=-1, keepdims=True)
        return (x32 * lax.rsqrt(var + eps) * w.astype(jnp.float32)).astype(x.dtype)

    fln = jax.jit(fln_pipe_layer)

    # Small synthetic shapes consistent with the pipeline stage:
    #   hidden_states [s, b, h] (seq-major), labels [b, s].
    cases = [
        ("aligned_f32", 16, 2, 128, jnp.float32),     # divisible rows, lane-dense h
        ("ragged_rows_bf16", 13, 3, 128, jnp.bfloat16),  # s*b=39 -> row padding path
        ("padded_hidden_f32", 8, 2, 96, jnp.float32),    # h=96 -> lane padding path
    ]

    for name, S, B, H, dtype in cases:
        k_h, k_w, k_lab, key = jax.random.split(key, 4)
        hidden_states = jax.random.normal(k_h, (S, B, H), dtype=jnp.float32).astype(dtype)
        weight = (1.0 + 0.1 * jax.random.normal(k_w, (H,), dtype=jnp.float32)).astype(dtype)
        labels = jax.random.randint(k_lab, (B, S), 0, 100, dtype=jnp.int32)

        out, labels_out = fln(hidden_states, labels, weight)
        jax.block_until_ready(out)

        ref = reference(hidden_states, weight)
        assert out.shape == (S, B, H), name
        assert out.dtype == hidden_states.dtype, name
        tol = 1e-5 if dtype == jnp.float32 else 2e-2
        assert jnp.allclose(out.astype(jnp.float32), ref.astype(jnp.float32),
                            atol=tol, rtol=tol), name
        assert jnp.array_equal(labels_out, labels), name

    print("KERNEL_OK")
</pallas_src>

<mosaic_0001>
module attributes {stable_mosaic.version = 11 : i64} {
  func.func @_rmsnorm_kernel(%arg0: i32, %arg1: memref<32x128xf32, #tpu.memory_space<vmem>>, %arg2: memref<1x128xf32, #tpu.memory_space<vmem>>, %arg3: memref<32x128xf32, #tpu.memory_space<vmem>>) attributes {dimension_semantics = [#tpu.dimension_semantics<parallel>], iteration_bounds = array<i64: 1>, scalar_prefetch = 0 : i64, scratch_operands = 0 : i64, tpu.core_type = #tpu.core_type<tc>, window_params = [{transform_indices = @transform_0, window_bounds = array<i64: 32, 128>}, {pipeline_mode = #tpu.pipeline_mode<synchronous>, transform_indices = @transform_1, window_bounds = array<i64: 1, 128>}, {transform_indices = @transform_2, window_bounds = array<i64: 32, 128>}]} {
    %c0 = arith.constant 0 : index
    %c0_0 = arith.constant 0 : index
    %0 = vector.load %arg1[%c0, %c0_0] : memref<32x128xf32, #tpu.memory_space<vmem>>, vector<32x128xf32>
    %1 = arith.mulf %0, %0 : vector<32x128xf32>
    %cst = arith.constant dense<0.000000e+00> : vector<32xf32>
    %2 = vector.multi_reduction <add>, %1, %cst [1] : vector<32x128xf32> to vector<32xf32>
    %3 = vector.shape_cast %2 : vector<32xf32> to vector<32x1xf32>
    %cst_1 = arith.constant 7.812500e-03 : f32
    %4 = vector.broadcast %cst_1 : f32 to vector<32x1xf32>
    %5 = arith.mulf %3, %4 : vector<32x1xf32>
    %cst_2 = arith.constant 9.99999974E-6 : f32
    %6 = vector.broadcast %cst_2 : f32 to vector<32x1xf32>
    %7 = arith.addf %5, %6 : vector<32x1xf32>
    %8 = math.rsqrt %7 : vector<32x1xf32>
    %9 = vector.broadcast %8 : vector<32x1xf32> to vector<32x128xf32>
    %10 = arith.mulf %0, %9 : vector<32x128xf32>
    %c0_3 = arith.constant 0 : index
    %c0_4 = arith.constant 0 : index
    %11 = vector.load %arg2[%c0_3, %c0_4] : memref<1x128xf32, #tpu.memory_space<vmem>>, vector<1x128xf32>
    %12 = vector.broadcast %11 : vector<1x128xf32> to vector<32x128xf32>
    %13 = arith.mulf %10, %12 : vector<32x128xf32>
    %c0_5 = arith.constant 0 : index
    %c0_6 = arith.constant 0 : index
    %14 = vector.load %arg3[%c0_5, %c0_6] : memref<32x128xf32, #tpu.memory_space<vmem>>, vector<32x128xf32>
    tpu.vector_store %arg3[%c0_5, %c0_6], %13 {strides = array<i32>} : memref<32x128xf32, #tpu.memory_space<vmem>>, vector<32x128xf32>,
    return
  }
  func.func @transform_0(%arg0: i32) -> (i32, i32) {
    %c0_i32 = arith.constant 0 : i32
    %c0_i32_0 = arith.constant 0 : i32
    return %arg0, %c0_i32 : i32, i32
  }
  func.func @transform_1(%arg0: i32) -> (i32, i32) {
    %c0_i32 = arith.constant 0 : i32
    %c0_i32_0 = arith.constant 0 : i32
    %c0_i32_1 = arith.constant 0 : i32
    return %c0_i32, %c0_i32_0 : i32, i32
  }
  func.func @transform_2(%arg0: i32) -> (i32, i32) {
    %c0_i32 = arith.constant 0 : i32
    %c0_i32_0 = arith.constant 0 : i32
    return %arg0, %c0_i32 : i32, i32
  }
}

</mosaic_0001>

<bundles_post_ra>
// kernel: fln_pipe_layer.1
= control target key start
LH: loop header
LB: loop body
LE: loop exit
PB: predicated region body
PF: predicated region fallthrough
CT: control target
= control target key end

     0   :  { %7 = vsyncpa [#allocation3], 0  ;;  %s203_s0 = inlined_call_operand.hbm [shape: f32[32,128], index: 0, kind: input, shape index: {}]   ;;  %s204_s1 = inlined_call_operand.vmem [shape: f32[1,128], index: 1, kind: input, shape index: {}]   ;;  %s205_s2 = inlined_call_operand.hbm [shape: f32[32,128], index: 2, kind: output, shape index: {}]  }
   0x1   :  { %8 = vsyncpa [#allocation4], 0  ;;  %s151_s9 = smov [#allocation2]   ;;  %s103_s13 = scalar_lea.hbm %s203_s0, 512 }
   0x2   :  { %s14_s10 = sshll.u32 %s151_s9, 4  ;;  %p104_p0 = scmp.ne.s32.totalorder %s203_s0, %s103_s13  ;;  %s15_s10 = int_to_ptr.vmem [resolvable:$true] %s14_s10 }
   0x3   :  { %p107_p1 = scmp.lt.u32.totalorder %s103_s13, %s203_s0 }
   0x5   :  { %p109_p2 = pnand %p107_p1, %p104_p0 }
   0x7   :  { %112 = shalt.err (!%p109_p2)
}
   0x8   :  { %s113_s18 = scalar_lea.vmem %s15_s10, 512  ;;  %p118_p4 = scmp.lt.s32.totalorder %s15_s10, %s15_s10 }
   0x9   :  { %p114_p3 = scmp.ne.s32.totalorder %s15_s10, %s113_s18  ;;  %p119_p5 = scmp.lt.s32.totalorder %s113_s18, %s113_s18 }
   0xb   :  { %p120_p6 = por %p119_p5, %p118_p4 }
   0xd   :  { %p121_p7 = pnand %p120_p6, %p114_p3 }
   0xf   :  { %124 = shalt.err (!%p121_p7)
}
  0x10   :  { %s152_s19 = smov 128   ;;  %s153_s20 = smov 8  }
  0x11   :  { %20 = dma.hbm_to_vmem [thread:$0]  %s203_s0, 512, %s15_s10, [#allocation3], %s152_s19, %s152_s19, %s153_s20  }
  0x12   :  { %147 = dma.done.wait [#allocation3], 512  }
  0x13   :  { %148 = vsyncadd [#allocation3], 4294966784  ;;  %v28_v0 = vld [vmem:[#allocation2 + $0x10] sm:$0xff]  ;;  %v26_v1 = vld [vmem:[#allocation2] sm:$0xff]  ;;  %s154_s24 = smov [#allocation5]  }
  0x14   :  { %v29_v2 = vld [vmem:[#allocation2 + $0x18] sm:$0xff]  ;;  %v32_v3 = vmul.f32 %v28_v0, %v28_v0  ;;  %v30_v4 = vmul.f32 %v26_v1, %v26_v1  ;;  %v27_v5 = vld [vmem:[#allocation2 + $0x8] sm:$0xff]  ;;  %v90_v21 = vld [vmem:[%s204_s1] ss:$0 sm:$0xff]  ;;  %s78_s25 = sshll.u32 %s154_s24, 4  ;;  %s79_s25 = int_to_ptr.vmem [resolvable:$true] %s78_s25 }
  0x15   :  { %v33_v6 = vmul.f32 %v29_v2, %v29_v2  ;;  %v31_v7 = vmul.f32 %v27_v5, %v27_v5  ;;  %s125_s26 = scalar_lea.vmem %s79_s25, 512  ;;  %p130_p9 = scmp.lt.s32.totalorder %s79_s25, %s79_s25 }
  0x16   :  { %38 = vadd.xlane.f32.xlu1 %v32_v3  ;;  %34 = vadd.xlane.f32.xlu0 %v30_v4  ;;  %p126_p8 = scmp.ne.s32.totalorder %s79_s25, %s125_s26  ;;  %p131_p10 = scmp.lt.s32.totalorder %s125_s26, %s125_s26 }
  0x18   :  { %p132_p11 = por %p131_p10, %p130_p9 }
  0x1a   :  { %40 = vadd.xlane.f32.xlu1 %v33_v6  ;;  %36 = vadd.xlane.f32.xlu0 %v31_v7  ;;  %p133_p12 = pnand %p132_p11, %p126_p8 }
  0xa3   :  { %v39_v8 = vpop.xlane.xlu1 %38  ;;  %v35_v9 = vpop.xlane.xlu0 %34 }
  0xa4   :  { %v44_v10 = vmul.f32 0.0078125, %v39_v8  ;;  %v42_v11 = vmul.f32 0.0078125, %v35_v9 }
  0xa6   :  { %v48_v12 = vadd.f32 1e-05, %v44_v10  ;;  %v46_v13 = vadd.f32 1e-05, %v42_v11 }
  0xa7   :  { %v41_v14 = vpop.xlane.xlu1 %40  ;;  %v37_v15 = vpop.xlane.xlu0 %36 }
  0xa8   :  { %95 = vrsqrt.f32 %v48_v12  ;;  %v45_v16 = vmul.f32 0.0078125, %v41_v14  ;;  %v43_v17 = vmul.f32 0.0078125, %v37_v15 }
  0xa9   :  { %97 = vrsqrt.f32 %v46_v13 }
  0xaa   :  { %v49_v18 = vadd.f32 1e-05, %v45_v16  ;;  %v47_v19 = vadd.f32 1e-05, %v43_v17 }
  0xac   :  { %99 = vrsqrt.f32 %v49_v18 }
  0xad   :  { %101 = vrsqrt.f32 %v47_v19 }
  0xb2   :  { %v96_v20 = vpop.eup %95 }
  0xb3   :  { %v98_v22 = vpop.eup %97  ;;  %v56_v23 = vmul.f32 %v96_v20, %v28_v0 }
  0xb4   :  { %v54_v24 = vmul.f32 %v98_v22, %v26_v1 }
  0xb5   :  { %v67_v25 = vmul.f32 %v90_v21, %v56_v23 }
  0xb6   :  { %v100_v26 = vpop.eup %99  ;;  %v65_v27 = vmul.f32 %v90_v21, %v54_v24 }
  0xb7   :  { %v102_v28 = vpop.eup %101  ;;  %v57_v29 = vmul.f32 %v100_v26, %v29_v2  ;;  %71 = vst [vmem:[#allocation5 + $0x10] sm:$0xff] %v67_v25 }
  0xb8   :  { %v55_v30 = vmul.f32 %v102_v28, %v27_v5  ;;  %69 = vst [vmem:[#allocation5] sm:$0xff] %v65_v27 }
  0xb9   :  { %v68_v31 = vmul.f32 %v90_v21, %v57_v29 }
  0xba   :  { %v66_v32 = vmul.f32 %v90_v21, %v55_v30 }
  0xbb   :  { %72 = vst [vmem:[#allocation5 + $0x18] sm:$0xff] %v68_v31 }
  0xbc   :  { %70 = vst [vmem:[#allocation5 + $0x8] sm:$0xff] %v66_v32 }
  0xbd   :  { %136 = shalt.err (!%p133_p12)
}
  0xbe   :  { %s137_s28 = scalar_lea.hbm %s205_s2, 512 }
  0xbf   :  { %p138_p13 = scmp.ne.s32.totalorder %s205_s2, %s137_s28  ;;  %p141_p0 = scmp.lt.u32.totalorder %s137_s28, %s205_s2 }
  0xc1   :  { %p143_p1 = pnand %p141_p0, %p138_p13 }
  0xc3   :  { %146 = shalt.err (!%p143_p1)
}
  0xc4   :  { %84 = dma.vmem_to_hbm [thread:$0]  %s79_s25, 512, %s205_s2, [#allocation4], %s152_s19, %s152_s19, %s153_s20  }
  0xc5   :  { %149 = dma.done.wait [#allocation4], 512  }
  0xc6   :  { %150 = vsyncadd [#allocation4], 4294966784 }
  0xc7   :  { %88 = vsyncpa [#allocation3], 1 }
  0xc8   :  { %89 = vsyncpa [#allocation4], 1 }

</bundles_post_ra>
